<compile_context>
chip_gen: v5e
topology: v5e:2x2
jax: 0.10.0
libtpu: 0.0.40
codegen_flags: <defaults>
</compile_context>

<pallas_src>
import jax
import jax.numpy as jnp
from jax.experimental import pallas as pl
from jax.experimental.pallas import tpu as pltpu


def _normalize_kernel(scale_ref, bias_ref, x_ref, o_ref):
    # (x - mean) / std  ==  x * (1/std) + (-mean/std)
    # scale/bias are (ROWS, 1) and broadcast against the (ROWS, H*W) tile on the VPU.
    o_ref[...] = x_ref[...] * scale_ref[...] + bias_ref[...]


def normalize_layer(x, mean, std, *, target_block_bytes=2 * 1024 * 1024):
    """Pallas equivalent of Normalize_layer.forward: (x - mean[c]) / std[c]."""
    N, C, H, W = x.shape
    assert mean.shape == (C,) and std.shape == (C,)

    R = N * C            # one row per (n, c) spatial plane
    L = H * W            # lane-dense last dim (full plane per row)

    # Lane-dense 2D view of the input (pure reshape, no transpose).
    x2 = x.reshape(R, L)

    # Per-row affine parameters: scale = 1/std[c], bias = -mean[c]/std[c].
    inv_std = (1.0 / std.astype(jnp.float32))
    scale = jnp.tile(inv_std, N).reshape(R, 1).astype(x.dtype)             # (R, 1)
    bias = jnp.tile(-mean.astype(jnp.float32) * inv_std, N).reshape(R, 1).astype(x.dtype)

    # Pick a multi-row block of roughly target_block_bytes of x.
    bytes_per_row = L * jnp.dtype(x.dtype).itemsize
    br = max(1, int(target_block_bytes // bytes_per_row))
    br = min(br, R)
    if br < R:
        # Second-to-last block dim must be a multiple of 8 (or equal the full dim).
        br = max(8, (br // 8) * 8)
        br = min(br, R)

    grid = (pl.cdiv(R, br),)

    row_vec_spec = pl.BlockSpec((br, 1), lambda i: (i, 0))   # scale / bias
    tile_spec = pl.BlockSpec((br, L), lambda i: (i, 0))      # x / out

    out2 = pl.pallas_call(
        _normalize_kernel,
        out_shape=jax.ShapeDtypeStruct((R, L), x.dtype),
        grid=grid,
        in_specs=[row_vec_spec, row_vec_spec, tile_spec],
        out_specs=tile_spec,
        compiler_params=pltpu.CompilerParams(
            dimension_semantics=("parallel",),
        ),
    )(scale, bias, x2)

    return out2.reshape(N, C, H, W)


if __name__ == "__main__":
    # Deterministic parameters exactly as in the PyTorch module's __init__.
    mean = jnp.array([0.5, 0.5, 0.5], dtype=jnp.float32)
    std = jnp.array([0.5, 0.5, 0.5], dtype=jnp.float32)

    # Small deterministic input: batch=2, channels=3 (module implies 3), 16x16 spatial.
    key = jax.random.PRNGKey(0)
    x = jax.random.uniform(key, (2, 3, 16, 16), dtype=jnp.float32)

    out = jax.block_until_ready(normalize_layer(x, mean, std))

    # Reference check against plain-JAX broadcasted computation.
    ref = (x - mean[None, :, None, None]) / std[None, :, None, None]
    assert out.shape == x.shape and out.dtype == x.dtype
    assert jnp.allclose(out, ref, atol=1e-6, rtol=1e-6)

    print("KERNEL_OK")
</pallas_src>

<mosaic_0001>
module attributes {stable_mosaic.version = 11 : i64} {
  func.func @_normalize_kernel(%arg0: i32, %arg1: memref<6x1xf32, #tpu.memory_space<vmem>>, %arg2: memref<6x1xf32, #tpu.memory_space<vmem>>, %arg3: memref<6x256xf32, #tpu.memory_space<vmem>>, %arg4: memref<6x256xf32, #tpu.memory_space<vmem>>) attributes {dimension_semantics = [#tpu.dimension_semantics<parallel>], iteration_bounds = array<i64: 1>, scalar_prefetch = 0 : i64, scratch_operands = 0 : i64, tpu.core_type = #tpu.core_type<tc>, window_params = [{transform_indices = @transform_0, window_bounds = array<i64: 6, 1>}, {transform_indices = @transform_1, window_bounds = array<i64: 6, 1>}, {transform_indices = @transform_2, window_bounds = array<i64: 6, 256>}, {transform_indices = @transform_3, window_bounds = array<i64: 6, 256>}]} {
    %c0 = arith.constant 0 : index
    %c0_0 = arith.constant 0 : index
    %0 = vector.load %arg3[%c0, %c0_0] : memref<6x256xf32, #tpu.memory_space<vmem>>, vector<6x256xf32>
    %c0_1 = arith.constant 0 : index
    %c0_2 = arith.constant 0 : index
    %1 = vector.load %arg1[%c0_1, %c0_2] : memref<6x1xf32, #tpu.memory_space<vmem>>, vector<6x1xf32>
    %2 = vector.broadcast %1 : vector<6x1xf32> to vector<6x256xf32>
    %3 = arith.mulf %0, %2 : vector<6x256xf32>
    %c0_3 = arith.constant 0 : index
    %c0_4 = arith.constant 0 : index
    %4 = vector.load %arg2[%c0_3, %c0_4] : memref<6x1xf32, #tpu.memory_space<vmem>>, vector<6x1xf32>
    %5 = vector.broadcast %4 : vector<6x1xf32> to vector<6x256xf32>
    %6 = arith.addf %3, %5 : vector<6x256xf32>
    %c0_5 = arith.constant 0 : index
    %c0_6 = arith.constant 0 : index
    %7 = vector.load %arg4[%c0_5, %c0_6] : memref<6x256xf32, #tpu.memory_space<vmem>>, vector<6x256xf32>
    tpu.vector_store %arg4[%c0_5, %c0_6], %6 {strides = array<i32>} : memref<6x256xf32, #tpu.memory_space<vmem>>, vector<6x256xf32>,
    return
  }
  func.func @transform_0(%arg0: i32) -> (i32, i32) {
    %c0_i32 = arith.constant 0 : i32
    %c0_i32_0 = arith.constant 0 : i32
    return %arg0, %c0_i32 : i32, i32
  }
  func.func @transform_1(%arg0: i32) -> (i32, i32) {
    %c0_i32 = arith.constant 0 : i32
    %c0_i32_0 = arith.constant 0 : i32
    return %arg0, %c0_i32 : i32, i32
  }
  func.func @transform_2(%arg0: i32) -> (i32, i32) {
    %c0_i32 = arith.constant 0 : i32
    %c0_i32_0 = arith.constant 0 : i32
    return %arg0, %c0_i32 : i32, i32
  }
  func.func @transform_3(%arg0: i32) -> (i32, i32) {
    %c0_i32 = arith.constant 0 : i32
    %c0_i32_0 = arith.constant 0 : i32
    return %arg0, %c0_i32 : i32, i32
  }
}

</mosaic_0001>

<bundles_post_ra>
// kernel: tpu_custom_call.1
= control target key start
LH: loop header
LB: loop body
LE: loop exit
PB: predicated region body
PF: predicated region fallthrough
CT: control target
= control target key end

     0   :  { %v80_v1 = vmov 0   ;;  %s117_s0 = inlined_call_operand.vmem [shape: f32[6,1], index: 0, kind: input, shape index: {}]   ;;  %s118_s1 = inlined_call_operand.vmem [shape: f32[6,1], index: 1, kind: input, shape index: {}]   ;;  %s119_s2 = inlined_call_operand.vmem [shape: f32[6,256], index: 2, kind: input, shape index: {}]   ;;  %s120_s3 = inlined_call_operand.hbm [shape: f32[6,256], index: 3, kind: output, shape index: {}]  }
   0x1   :  { %v17_v0 = vld [vmem:[%s117_s0] sm:$0x3f]  ;;  %53 = vset.pattern.permute.xlu0 %v80_v1 }
   0x2   :  { %8 = vsyncpa [#allocation3], 0  ;;  %20 = vperm.xlu0 %53, %v17_v0   ;;  %v25_v2 = vld [vmem:[%s118_s1] sm:$0x3f]  ;;  %v16_v5 = vld [vmem:[%s119_s2 + $0x8] sm:$0x3f] }
   0x3   :  { %v15_v4 = vld [vmem:[%s119_s2] sm:$0x3f]  ;;  %s81_s0 = smov [#allocation2]   ;;  %s42_s23 = sshll.u32 %s120_s3, 4  ;;  %s43_s23 = int_to_ptr.hbm [resolvable:$true] %s42_s23 }
   0x4   :  { %s40_s20 = sshll.u32 %s81_s0, 4  ;;  %s41_s20 = int_to_ptr.vmem [resolvable:$true] %s40_s20 }
   0xa   :  { %28 = vperm.xlu0 %53, %v25_v2  }
  0x74   :  { %v21_v3 = vpop.permute.xlu0 %20 }
  0x75   :  { %v23_v6 = vmul.f32 %v21_v3, %v15_v4  ;;  %v24_v7 = vmul.f32 %v21_v3, %v16_v5 }
  0x7c   :  { %v29_v8 = vpop.permute.xlu0 %28 }
  0x7d   :  { %v31_v9 = vadd.f32 %v29_v8, %v23_v6  ;;  %v32_v10 = vadd.f32 %v29_v8, %v24_v7 }
  0x7f   :  { %33 = vst [vmem:[#allocation2] sm:$0x3f] %v31_v9 }
  0x80   :  { %34 = vst [vmem:[#allocation2 + $0x8] sm:$0x3f] %v32_v10 }
  0x81   :  { %45 = dma.vmem_to_hbm [thread:$0]  %s41_s20, 256, %s43_s23, [#allocation3]  }
  0x82   :  { %78 = dma.done.wait [#allocation3], 256  }
  0x83   :  { %79 = vsyncadd [#allocation3], 4294967040 }
  0x84   :  { %50 = vsyncpa [#allocation3], 1 }

</bundles_post_ra>
